<compile_context>
chip_gen: v5e
topology: v5e:2x2
jax: 0.10.0
libtpu: 0.0.40
codegen_flags: <defaults>
</compile_context>

<pallas_src>
import jax
import jax.numpy as jnp
from jax import lax
from jax.experimental import pallas as pl
from jax.experimental.pallas import tpu as pltpu


# ----------------------------------------------------------------------------
# Fused kernel: one grid step == the whole forward for the whole batch.
# ----------------------------------------------------------------------------
def phrase_layer_kernel(lang_ref, img_ref, fact_ref, sidew_ref, bias_ref,
                        convw_ref, convb_ref, mlpw_ref, mlpb_ref, out_ref):
    f32 = jnp.float32
    B, L, H = lang_ref.shape
    inv_sqrt_h = f32(1.0 / (H ** 0.5))

    def softmax_rows(s):
        # row-wise softmax; denominator reciprocal goes to the EUP (free slot).
        s = s - jnp.max(s, axis=-1, keepdims=True)
        p = jnp.exp(s)
        return p * pl.reciprocal(jnp.sum(p, axis=-1, keepdims=True), approx=True)

    # ---- cnn: Conv1d(kernel=3, padding=1) + ReLU ---------------------------
    # Both batch elements share ONE im2col matmul (B*L, 3H) @ (3H, H).
    # Shifted rows come from sublane rolls (XLU); cross-boundary rows are
    # zeroed with an iota mask (also handles the batch0/batch1 seam).
    x = lang_ref[...].astype(f32).reshape(B * L, H)                 # (B*L, H)
    pos = lax.broadcasted_iota(jnp.int32, (B * L, H), 0) % L        # in-batch row
    x_m1 = jnp.where(pos == 0,     0.0, pltpu.roll(x, shift=1, axis=0))
    x_p1 = jnp.where(pos == L - 1, 0.0, pltpu.roll(x, shift=B * L - 1, axis=0))
    xcat = jnp.concatenate([x_m1, x, x_p1], axis=1)                 # (B*L, 3H)
    ctx_all = jnp.maximum(
        jnp.dot(xcat, convw_ref[...], preferred_element_type=f32) + convb_ref[...],
        0.0)                                                        # (B*L, H)

    # Weight loads hoisted once out of the (unrolled) batch loop.
    mlpw = mlpw_ref[...].astype(f32)                                # (2H, H)
    mlpw_pool, mlpw_feat = mlpw[:H, :], mlpw[H:, :]
    mlpb = mlpb_ref[...].astype(f32)                                # (1, H)

    outs = []
    for b in range(B):                                              # B static -> unrolled
        ctx = ctx_all[b * L:(b + 1) * L, :]                         # (L, H) context_feat
        img = img_ref[b].astype(f32)                                # (N, H)
        facts = fact_ref[b].astype(f32)                             # (F, H)
        bias_row = bias_ref[b].astype(f32)                          # (1, L+F) additive
        qbias, fbias = bias_row[:, :L], bias_row[:, L:]             # (1,L), (1,F)
        sw = sidew_ref[b].astype(f32)                               # (2, H)
        featw, bankw = sw[0:1, :], sw[1:2, :]                       # (1,H), (1,H)

        # ---- img_attn: Q=img, K=V=context, additive key bias --------------
        s = lax.dot_general(img * inv_sqrt_h, ctx, (((1,), (1,)), ((), ())),
                            preferred_element_type=f32) + qbias     # (N, L)
        img_att = jnp.dot(softmax_rows(s), ctx,
                          preferred_element_type=f32)               # (N, H)

        # ---- word_attn: Q=context, K=V=img_att, mask-free ------------------
        s2 = lax.dot_general(ctx * inv_sqrt_h, img_att, (((1,), (1,)), ((), ())),
                             preferred_element_type=f32)            # (L, N)
        ques_att = jnp.dot(softmax_rows(s2), img_att,
                           preferred_element_type=f32)              # (L, H)

        # ---- pooling: mean over the sequence axis --------------------------
        img_pool = jnp.mean(img_att, axis=0, keepdims=True)         # (1, H)
        ques_pool = jnp.mean(ques_att, axis=0, keepdims=True)       # (1, H)
        pool_sum = img_pool + ques_pool

        # ---- dropout(eval)=identity; cat folded into split MLP matmul ------
        y = (jnp.dot(pool_sum, mlpw_pool, preferred_element_type=f32)
             + jnp.dot(featw, mlpw_feat, preferred_element_type=f32) + mlpb)
        feat_p = jnp.tanh(y)                                        # (1, H)

        # ---- fact_extract: summed-query masked attention over facts + pool -
        # TODO(synk): `fact_extract` is not defined in the source file; this is
        # a faithful reconstruction (summed-query masked fact attention).
        query = (pool_sum + feat_p + bankw) * inv_sqrt_h            # (1, H)
        s3 = lax.dot_general(query, facts, (((1,), (1,)), ((), ())),
                             preferred_element_type=f32) + fbias    # (1, F)
        bank_p = jnp.dot(softmax_rows(s3), facts,
                         preferred_element_type=f32)                # (1, H)

        outs += [feat_p, bank_p]

    # Single lane-dense store: [feat_b0 | bank_b0 | feat_b1 | bank_b1 | ...]
    out_ref[...] = jnp.concatenate(outs, axis=1).astype(out_ref.dtype)


# ----------------------------------------------------------------------------
# Wrapper: single pallas_call, single grid step, packed inputs, fused output.
# ----------------------------------------------------------------------------
def phrase_layer_forward(params, lang_embeddings, ques_masks, img_embeddings,
                         fact_embeddings, fact_masks, feat_w, bank_w):
    B, L, H = lang_embeddings.shape
    N = img_embeddings.shape[1]
    F = fact_embeddings.shape[1]
    dtype = lang_embeddings.dtype

    # Host-side layout prep (cheap, contiguous).
    conv_w = params["conv_w"].reshape(3 * H, H)     # im2col: [x[i-1] | x[i] | x[i+1]] taps
    conv_b = params["conv_b"]                       # (1, H)
    mlp_w = params["mlp_w"]                         # (2H, H): [pooled half; feat_w half]
    mlp_b = params["mlp_b"]                         # (1, H)

    # Masks -> additive key biases (0 valid, -1e30 masked), packed into one slab.
    qbias = (ques_masks.astype(jnp.float32) - 1.0) * 1e30           # (B, L)
    fbias = (fact_masks.astype(jnp.float32) - 1.0) * 1e30           # (B, F)
    mask_bias = jnp.concatenate([qbias, fbias], axis=1).reshape(B, 1, L + F)

    side_w = jnp.stack([feat_w, bank_w], axis=1)                    # (B, 2, H)

    out = pl.pallas_call(
        phrase_layer_kernel,
        out_shape=jax.ShapeDtypeStruct((1, B * 2 * H), dtype),      # lane-dense slab
        grid=(1,),                                                  # one step, whole batch
        in_specs=[
            pl.BlockSpec((B, L, H), lambda i: (0, 0, 0)),           # lang_embeddings
            pl.BlockSpec((B, N, H), lambda i: (0, 0, 0)),           # img_embeddings
            pl.BlockSpec((B, F, H), lambda i: (0, 0, 0)),           # fact_embeddings
            pl.BlockSpec((B, 2, H), lambda i: (0, 0, 0)),           # [feat_w, bank_w]
            pl.BlockSpec((B, 1, L + F), lambda i: (0, 0, 0)),       # packed mask biases
            pl.BlockSpec((3 * H, H), lambda i: (0, 0)),             # conv weight (im2col)
            pl.BlockSpec((1, H), lambda i: (0, 0)),                 # conv bias
            pl.BlockSpec((2 * H, H), lambda i: (0, 0)),             # mlp weight
            pl.BlockSpec((1, H), lambda i: (0, 0)),                 # mlp bias
        ],
        out_specs=pl.BlockSpec((1, B * 2 * H), lambda i: (0, 0)),
        compiler_params=pltpu.CompilerParams(dimension_semantics=("arbitrary",)),
    )(lang_embeddings, img_embeddings, fact_embeddings, side_w, mask_bias,
      conv_w, conv_b, mlp_w, mlp_b)

    out = out.reshape(B, 2, H)
    return out[:, 0, :], out[:, 1, :]                               # feat_p, bank_p


# ----------------------------------------------------------------------------
# Main
# ----------------------------------------------------------------------------
if __name__ == "__main__":
    B, L, N, F, H = 2, 8, 16, 8, 32   # batch, question len, image regions, facts, hidden

    key = jax.random.PRNGKey(0)
    k1, k2, k3, k4, k5, k6, k7 = jax.random.split(key, 7)

    # deterministic parameter init (synthetic; no checkpoint)
    params = {
        "conv_w": jax.random.normal(k1, (3, H, H), jnp.float32) * (1.0 / (3 * H) ** 0.5),
        "conv_b": jnp.zeros((1, H), jnp.float32),
        "mlp_w": jax.random.normal(k2, (2 * H, H), jnp.float32) * (1.0 / (2 * H) ** 0.5),
        "mlp_b": jnp.zeros((1, H), jnp.float32),
    }

    # deterministic inputs
    lang_embeddings = jax.random.normal(k3, (B, L, H), jnp.float32)
    img_embeddings = jax.random.normal(k4, (B, N, H), jnp.float32)
    fact_embeddings = jax.random.normal(k5, (B, F, H), jnp.float32)
    feat_w = jax.random.normal(k6, (B, H), jnp.float32)
    bank_w = jax.random.normal(k7, (B, H), jnp.float32)

    # masks: batch 0 fully valid, batch 1 has trailing padding
    ques_masks = jnp.stack(
        [jnp.ones((L,)), jnp.concatenate([jnp.ones((L - 3,)), jnp.zeros((3,))])]
    ).astype(jnp.float32)
    fact_masks = jnp.stack(
        [jnp.ones((F,)), jnp.concatenate([jnp.ones((F - 2,)), jnp.zeros((2,))])]
    ).astype(jnp.float32)

    feat_p, bank_p = jax.jit(phrase_layer_forward)(
        params, lang_embeddings, ques_masks, img_embeddings,
        fact_embeddings, fact_masks, feat_w, bank_w,
    )
    jax.block_until_ready((feat_p, bank_p))

    assert feat_p.shape == (B, H) and bank_p.shape == (B, H)
    assert bool(jnp.all(jnp.isfinite(feat_p))) and bool(jnp.all(jnp.isfinite(bank_p)))
    print("KERNEL_OK")
</pallas_src>

<mosaic_0001>
module attributes {stable_mosaic.version = 11 : i64} {
  func.func @phrase_layer_kernel(%arg0: i32, %arg1: memref<2x8x32xf32, #tpu.memory_space<vmem>>, %arg2: memref<2x16x32xf32, #tpu.memory_space<vmem>>, %arg3: memref<2x8x32xf32, #tpu.memory_space<vmem>>, %arg4: memref<2x2x32xf32, #tpu.memory_space<vmem>>, %arg5: memref<2x1x16xf32, #tpu.memory_space<vmem>>, %arg6: memref<96x32xf32, #tpu.memory_space<vmem>>, %arg7: memref<1x32xf32, #tpu.memory_space<vmem>>, %arg8: memref<64x32xf32, #tpu.memory_space<vmem>>, %arg9: memref<1x32xf32, #tpu.memory_space<vmem>>, %arg10: memref<1x128xf32, #tpu.memory_space<vmem>>) attributes {dimension_semantics = [#tpu.dimension_semantics<arbitrary>], iteration_bounds = array<i64: 1>, scalar_prefetch = 0 : i64, scratch_operands = 0 : i64, tpu.core_type = #tpu.core_type<tc>, window_params = [{pipeline_mode = #tpu.pipeline_mode<synchronous>, transform_indices = @transform_0, window_bounds = array<i64: 2, 8, 32>}, {pipeline_mode = #tpu.pipeline_mode<synchronous>, transform_indices = @transform_1, window_bounds = array<i64: 2, 16, 32>}, {pipeline_mode = #tpu.pipeline_mode<synchronous>, transform_indices = @transform_2, window_bounds = array<i64: 2, 8, 32>}, {pipeline_mode = #tpu.pipeline_mode<synchronous>, transform_indices = @transform_3, window_bounds = array<i64: 2, 2, 32>}, {pipeline_mode = #tpu.pipeline_mode<synchronous>, transform_indices = @transform_4, window_bounds = array<i64: 2, 1, 16>}, {pipeline_mode = #tpu.pipeline_mode<synchronous>, transform_indices = @transform_5, window_bounds = array<i64: 96, 32>}, {pipeline_mode = #tpu.pipeline_mode<synchronous>, transform_indices = @transform_6, window_bounds = array<i64: 1, 32>}, {pipeline_mode = #tpu.pipeline_mode<synchronous>, transform_indices = @transform_7, window_bounds = array<i64: 64, 32>}, {pipeline_mode = #tpu.pipeline_mode<synchronous>, transform_indices = @transform_8, window_bounds = array<i64: 1, 32>}, {pipeline_mode = #tpu.pipeline_mode<synchronous>, transform_indices = @transform_9, window_bounds = array<i64: 1, 128>}]} {
    %c0 = arith.constant 0 : index
    %c0_0 = arith.constant 0 : index
    %c0_1 = arith.constant 0 : index
    %0 = vector.load %arg1[%c0, %c0_0, %c0_1] : memref<2x8x32xf32, #tpu.memory_space<vmem>>, vector<2x8x32xf32>
    %1 = vector.shape_cast %0 : vector<2x8x32xf32> to vector<16x32xf32>
    %2 = tpu.iota {dimensions = array<i32: 0>} : vector<16x32xi32>
    %c8_i32 = arith.constant 8 : i32
    %c0_i32 = arith.constant 0 : i32
    %3 = arith.cmpi eq, %c8_i32, %c0_i32 : i32
    %c1_i32 = arith.constant 1 : i32
    %4 = arith.select %3, %c1_i32, %c8_i32 : i32
    %5 = vector.broadcast %4 : i32 to vector<16x32xi32>
    %6 = arith.remsi %2, %5 : vector<16x32xi32>
    %c0_i32_2 = arith.constant 0 : i32
    %7 = vector.broadcast %c0_i32_2 : i32 to vector<16x32xi32>
    %8 = arith.cmpi ne, %6, %7 : vector<16x32xi32>
    %c0_i32_3 = arith.constant 0 : i32
    %9 = vector.broadcast %c0_i32_3 : i32 to vector<16x32xi32>
    %10 = arith.cmpi slt, %6, %9 : vector<16x32xi32>
    %c0_i32_4 = arith.constant 0 : i32
    %11 = arith.cmpi slt, %4, %c0_i32_4 : i32
    %12 = vector.broadcast %11 : i1 to vector<16x32xi1>
    %13 = vector.broadcast %12 : vector<16x32xi1> to vector<16x32xi1>
    %14 = arith.xori %10, %13 : vector<16x32xi1>
    %15 = arith.andi %14, %8 : vector<16x32xi1>
    %16 = vector.broadcast %4 : i32 to vector<16x32xi32>
    %17 = arith.addi %6, %16 : vector<16x32xi32>
    %18 = arith.select %15, %17, %6 : vector<16x32xi1>, vector<16x32xi32>
    %c0_i32_5 = arith.constant 0 : i32
    %19 = vector.broadcast %c0_i32_5 : i32 to vector<16x32xi32>
    %20 = arith.cmpi eq, %18, %19 : vector<16x32xi32>
    %c1_i32_6 = arith.constant 1 : i32
    %21 = tpu.dynamic_rotate %1 by %c1_i32_6 dim 0 : vector<16x32xf32>, i32 -> vector<16x32xf32>
    %cst = arith.constant 0.000000e+00 : f32
    %22 = vector.broadcast %cst : f32 to vector<16x32xf32>
    %23 = arith.select %20, %22, %21 : vector<16x32xi1>, vector<16x32xf32>
    %c7_i32 = arith.constant 7 : i32
    %24 = vector.broadcast %c7_i32 : i32 to vector<16x32xi32>
    %25 = arith.cmpi eq, %18, %24 : vector<16x32xi32>
    %c15_i32 = arith.constant 15 : i32
    %26 = tpu.dynamic_rotate %1 by %c15_i32 dim 0 : vector<16x32xf32>, i32 -> vector<16x32xf32>
    %cst_7 = arith.constant 0.000000e+00 : f32
    %27 = vector.broadcast %cst_7 : f32 to vector<16x32xf32>
    %28 = arith.select %25, %27, %26 : vector<16x32xi1>, vector<16x32xf32>
    %29 = tpu.concatenate %23, %1, %28 in 1 : vector<16x32xf32>, vector<16x32xf32>, vector<16x32xf32> -> vector<16x96xf32>
    %c0_8 = arith.constant 0 : index
    %c0_9 = arith.constant 0 : index
    %30 = vector.load %arg6[%c0_8, %c0_9] : memref<96x32xf32, #tpu.memory_space<vmem>>, vector<96x32xf32>
    %cst_10 = arith.constant dense<0.000000e+00> : vector<16x32xf32>
    %31 = tpu.matmul %29, %30, %cst_10 {dimension_numbers = #tpu.dot_dimension_numbers<[1], [0], [0], [1], [0, 0, 1, 1], [], []>} : vector<16x96xf32>, vector<96x32xf32>, vector<16x32xf32> -> vector<16x32xf32>
    %c0_11 = arith.constant 0 : index
    %c0_12 = arith.constant 0 : index
    %32 = vector.load %arg7[%c0_11, %c0_12] : memref<1x32xf32, #tpu.memory_space<vmem>>, vector<1x32xf32>
    %33 = vector.broadcast %32 : vector<1x32xf32> to vector<16x32xf32>
    %34 = arith.addf %31, %33 : vector<16x32xf32>
    %cst_13 = arith.constant 0.000000e+00 : f32
    %35 = vector.broadcast %cst_13 : f32 to vector<16x32xf32>
    %36 = arith.maximumf %34, %35 : vector<16x32xf32>
    %c0_14 = arith.constant 0 : index
    %c0_15 = arith.constant 0 : index
    %37 = vector.load %arg8[%c0_14, %c0_15] : memref<64x32xf32, #tpu.memory_space<vmem>>, vector<64x32xf32>
    %38 = vector.extract_strided_slice %37 {offsets = [0, 0], sizes = [32, 32], strides = [1, 1]} : vector<64x32xf32> to vector<32x32xf32>
    %39 = vector.extract_strided_slice %37 {offsets = [32, 0], sizes = [32, 32], strides = [1, 1]} : vector<64x32xf32> to vector<32x32xf32>
    %c0_16 = arith.constant 0 : index
    %c0_17 = arith.constant 0 : index
    %40 = vector.load %arg9[%c0_16, %c0_17] : memref<1x32xf32, #tpu.memory_space<vmem>>, vector<1x32xf32>
    %41 = vector.extract_strided_slice %36 {offsets = [0, 0], sizes = [8, 32], strides = [1, 1]} : vector<16x32xf32> to vector<8x32xf32>
    %c0_18 = arith.constant 0 : index
    %c0_19 = arith.constant 0 : index
    %c0_20 = arith.constant 0 : index
    %42 = vector.load %arg2[%c0_18, %c0_19, %c0_20] : memref<2x16x32xf32, #tpu.memory_space<vmem>>, vector<1x16x32xf32>
    %43 = vector.shape_cast %42 : vector<1x16x32xf32> to vector<16x32xf32>
    %c0_21 = arith.constant 0 : index
    %c0_22 = arith.constant 0 : index
    %c0_23 = arith.constant 0 : index
    %44 = vector.load %arg3[%c0_21, %c0_22, %c0_23] : memref<2x8x32xf32, #tpu.memory_space<vmem>>, vector<1x8x32xf32>
    %45 = vector.shape_cast %44 : vector<1x8x32xf32> to vector<8x32xf32>
    %c0_24 = arith.constant 0 : index
    %c0_25 = arith.constant 0 : index
    %c0_26 = arith.constant 0 : index
    %46 = vector.load %arg5[%c0_24, %c0_25, %c0_26] : memref<2x1x16xf32, #tpu.memory_space<vmem>>, vector<1x1x16xf32>
    %47 = vector.shape_cast %46 : vector<1x1x16xf32> to vector<1x16xf32>
    %48 = vector.extract_strided_slice %47 {offsets = [0, 0], sizes = [1, 8], strides = [1, 1]} : vector<1x16xf32> to vector<1x8xf32>
    %49 = vector.extract_strided_slice %47 {offsets = [0, 8], sizes = [1, 8], strides = [1, 1]} : vector<1x16xf32> to vector<1x8xf32>
    %c0_27 = arith.constant 0 : index
    %c0_28 = arith.constant 0 : index
    %c0_29 = arith.constant 0 : index
    %50 = vector.load %arg4[%c0_27, %c0_28, %c0_29] : memref<2x2x32xf32, #tpu.memory_space<vmem>>, vector<1x2x32xf32>
    %51 = vector.shape_cast %50 : vector<1x2x32xf32> to vector<2x32xf32>
    %52 = vector.extract_strided_slice %51 {offsets = [0, 0], sizes = [1, 32], strides = [1, 1]} : vector<2x32xf32> to vector<1x32xf32>
    %53 = vector.extract_strided_slice %51 {offsets = [1, 0], sizes = [1, 32], strides = [1, 1]} : vector<2x32xf32> to vector<1x32xf32>
    %cst_30 = arith.constant 0.176776692 : f32
    %54 = vector.broadcast %cst_30 : f32 to vector<16x32xf32>
    %55 = arith.mulf %43, %54 : vector<16x32xf32>
    %cst_31 = arith.constant dense<0.000000e+00> : vector<16x8xf32>
    %56 = tpu.matmul %55, %41, %cst_31 {dimension_numbers = #tpu.dot_dimension_numbers<[1], [1], [0], [0], [0, 0, 1, 0], [], []>} : vector<16x32xf32>, vector<8x32xf32>, vector<16x8xf32> -> vector<16x8xf32>
    %57 = vector.broadcast %48 : vector<1x8xf32> to vector<16x8xf32>
    %58 = arith.addf %56, %57 : vector<16x8xf32>
    %cst_32 = arith.constant dense<0xFF800000> : vector<16xf32>
    %59 = vector.multi_reduction <maximumf>, %58, %cst_32 [1] : vector<16x8xf32> to vector<16xf32>
    %60 = vector.shape_cast %59 : vector<16xf32> to vector<16x1xf32>
    %61 = vector.broadcast %60 : vector<16x1xf32> to vector<16x8xf32>
    %62 = arith.subf %58, %61 : vector<16x8xf32>
    %63 = math.exp %62 : vector<16x8xf32>
    %cst_33 = arith.constant dense<0.000000e+00> : vector<16xf32>
    %64 = vector.multi_reduction <add>, %63, %cst_33 [1] : vector<16x8xf32> to vector<16xf32>
    %65 = vector.shape_cast %64 : vector<16xf32> to vector<16x1xf32>
    %66 = tpu.reciprocal %65 {approx = true} : vector<16x1xf32> -> vector<16x1xf32>
    %67 = vector.broadcast %66 : vector<16x1xf32> to vector<16x8xf32>
    %68 = arith.mulf %63, %67 : vector<16x8xf32>
    %cst_34 = arith.constant dense<0.000000e+00> : vector<16x32xf32>
    %69 = tpu.matmul %68, %41, %cst_34 {dimension_numbers = #tpu.dot_dimension_numbers<[1], [0], [0], [1], [0, 0, 1, 1], [], []>} : vector<16x8xf32>, vector<8x32xf32>, vector<16x32xf32> -> vector<16x32xf32>
    %cst_35 = arith.constant 0.176776692 : f32
    %70 = vector.broadcast %cst_35 : f32 to vector<8x32xf32>
    %71 = arith.mulf %41, %70 : vector<8x32xf32>
    %cst_36 = arith.constant dense<0.000000e+00> : vector<8x16xf32>
    %72 = tpu.matmul %71, %69, %cst_36 {dimension_numbers = #tpu.dot_dimension_numbers<[1], [1], [0], [0], [0, 0, 1, 0], [], []>} : vector<8x32xf32>, vector<16x32xf32>, vector<8x16xf32> -> vector<8x16xf32>
    %cst_37 = arith.constant dense<0xFF800000> : vector<8xf32>
    %73 = vector.multi_reduction <maximumf>, %72, %cst_37 [1] : vector<8x16xf32> to vector<8xf32>
    %74 = vector.shape_cast %73 : vector<8xf32> to vector<8x1xf32>
    %75 = vector.broadcast %74 : vector<8x1xf32> to vector<8x16xf32>
    %76 = arith.subf %72, %75 : vector<8x16xf32>
    %77 = math.exp %76 : vector<8x16xf32>
    %cst_38 = arith.constant dense<0.000000e+00> : vector<8xf32>
    %78 = vector.multi_reduction <add>, %77, %cst_38 [1] : vector<8x16xf32> to vector<8xf32>
    %79 = vector.shape_cast %78 : vector<8xf32> to vector<8x1xf32>
    %80 = tpu.reciprocal %79 {approx = true} : vector<8x1xf32> -> vector<8x1xf32>
    %81 = vector.broadcast %80 : vector<8x1xf32> to vector<8x16xf32>
    %82 = arith.mulf %77, %81 : vector<8x16xf32>
    %cst_39 = arith.constant dense<0.000000e+00> : vector<8x32xf32>
    %83 = tpu.matmul %82, %69, %cst_39 {dimension_numbers = #tpu.dot_dimension_numbers<[1], [0], [0], [1], [0, 0, 1, 1], [], []>} : vector<8x16xf32>, vector<16x32xf32>, vector<8x32xf32> -> vector<8x32xf32>
    %cst_40 = arith.constant dense<0.000000e+00> : vector<32xf32>
    %84 = vector.multi_reduction <add>, %69, %cst_40 [0] : vector<16x32xf32> to vector<32xf32>
    %85 = vector.shape_cast %84 : vector<32xf32> to vector<1x32xf32>
    %cst_41 = arith.constant 1.600000e+01 : f32
    %86 = vector.broadcast %cst_41 : f32 to vector<1x32xf32>
    %87 = arith.divf %85, %86 : vector<1x32xf32>
    %cst_42 = arith.constant dense<0.000000e+00> : vector<32xf32>
    %88 = vector.multi_reduction <add>, %83, %cst_42 [0] : vector<8x32xf32> to vector<32xf32>
    %89 = vector.shape_cast %88 : vector<32xf32> to vector<1x32xf32>
    %cst_43 = arith.constant 8.000000e+00 : f32
    %90 = vector.broadcast %cst_43 : f32 to vector<1x32xf32>
    %91 = arith.divf %89, %90 : vector<1x32xf32>
    %92 = arith.addf %87, %91 : vector<1x32xf32>
    %cst_44 = arith.constant dense<0.000000e+00> : vector<1x32xf32>
    %93 = tpu.matmul %92, %38, %cst_44 {dimension_numbers = #tpu.dot_dimension_numbers<[1], [0], [0], [1], [0, 0, 1, 1], [], []>} : vector<1x32xf32>, vector<32x32xf32>, vector<1x32xf32> -> vector<1x32xf32>
    %cst_45 = arith.constant dense<0.000000e+00> : vector<1x32xf32>
    %94 = tpu.matmul %52, %39, %cst_45 {dimension_numbers = #tpu.dot_dimension_numbers<[1], [0], [0], [1], [0, 0, 1, 1], [], []>} : vector<1x32xf32>, vector<32x32xf32>, vector<1x32xf32> -> vector<1x32xf32>
    %95 = arith.addf %93, %94 : vector<1x32xf32>
    %96 = arith.addf %95, %40 : vector<1x32xf32>
    %97 = math.tanh %96 : vector<1x32xf32>
    %98 = arith.addf %92, %97 : vector<1x32xf32>
    %99 = arith.addf %98, %53 : vector<1x32xf32>
    %cst_46 = arith.constant 0.176776692 : f32
    %100 = vector.broadcast %cst_46 : f32 to vector<1x32xf32>
    %101 = arith.mulf %99, %100 : vector<1x32xf32>
    %cst_47 = arith.constant dense<0.000000e+00> : vector<1x8xf32>
    %102 = tpu.matmul %101, %45, %cst_47 {dimension_numbers = #tpu.dot_dimension_numbers<[1], [1], [0], [0], [0, 0, 1, 0], [], []>} : vector<1x32xf32>, vector<8x32xf32>, vector<1x8xf32> -> vector<1x8xf32>
    %103 = arith.addf %102, %49 : vector<1x8xf32>
    %cst_48 = arith.constant dense<0xFF800000> : vector<1xf32>
    %104 = vector.multi_reduction <maximumf>, %103, %cst_48 [1] : vector<1x8xf32> to vector<1xf32>
    %105 = vector.shape_cast %104 : vector<1xf32> to vector<1x1xf32>
    %106 = vector.broadcast %105 : vector<1x1xf32> to vector<1x8xf32>
    %107 = arith.subf %103, %106 : vector<1x8xf32>
    %108 = math.exp %107 : vector<1x8xf32>
    %cst_49 = arith.constant dense<0.000000e+00> : vector<1xf32>
    %109 = vector.multi_reduction <add>, %108, %cst_49 [1] : vector<1x8xf32> to vector<1xf32>
    %110 = vector.shape_cast %109 : vector<1xf32> to vector<1x1xf32>
    %111 = tpu.reciprocal %110 {approx = true} : vector<1x1xf32> -> vector<1x1xf32>
    %112 = vector.broadcast %111 : vector<1x1xf32> to vector<1x8xf32>
    %113 = arith.mulf %108, %112 : vector<1x8xf32>
    %cst_50 = arith.constant dense<0.000000e+00> : vector<1x32xf32>
    %114 = tpu.matmul %113, %45, %cst_50 {dimension_numbers = #tpu.dot_dimension_numbers<[1], [0], [0], [1], [0, 0, 1, 1], [], []>} : vector<1x8xf32>, vector<8x32xf32>, vector<1x32xf32> -> vector<1x32xf32>
    %115 = vector.extract_strided_slice %36 {offsets = [8, 0], sizes = [8, 32], strides = [1, 1]} : vector<16x32xf32> to vector<8x32xf32>
    %c1 = arith.constant 1 : index
    %c0_51 = arith.constant 0 : index
    %c0_52 = arith.constant 0 : index
    %116 = vector.load %arg2[%c1, %c0_51, %c0_52] : memref<2x16x32xf32, #tpu.memory_space<vmem>>, vector<1x16x32xf32>
    %117 = vector.shape_cast %116 : vector<1x16x32xf32> to vector<16x32xf32>
    %c1_53 = arith.constant 1 : index
    %c0_54 = arith.constant 0 : index
    %c0_55 = arith.constant 0 : index
    %118 = vector.load %arg3[%c1_53, %c0_54, %c0_55] : memref<2x8x32xf32, #tpu.memory_space<vmem>>, vector<1x8x32xf32>
    %119 = vector.shape_cast %118 : vector<1x8x32xf32> to vector<8x32xf32>
    %c1_56 = arith.constant 1 : index
    %c0_57 = arith.constant 0 : index
    %c0_58 = arith.constant 0 : index
    %120 = vector.load %arg5[%c1_56, %c0_57, %c0_58] : memref<2x1x16xf32, #tpu.memory_space<vmem>>, vector<1x1x16xf32>
    %121 = vector.shape_cast %120 : vector<1x1x16xf32> to vector<1x16xf32>
    %122 = vector.extract_strided_slice %121 {offsets = [0, 0], sizes = [1, 8], strides = [1, 1]} : vector<1x16xf32> to vector<1x8xf32>
    %123 = vector.extract_strided_slice %121 {offsets = [0, 8], sizes = [1, 8], strides = [1, 1]} : vector<1x16xf32> to vector<1x8xf32>
    %c1_59 = arith.constant 1 : index
    %c0_60 = arith.constant 0 : index
    %c0_61 = arith.constant 0 : index
    %124 = vector.load %arg4[%c1_59, %c0_60, %c0_61] : memref<2x2x32xf32, #tpu.memory_space<vmem>>, vector<1x2x32xf32>
    %125 = vector.shape_cast %124 : vector<1x2x32xf32> to vector<2x32xf32>
    %126 = vector.extract_strided_slice %125 {offsets = [0, 0], sizes = [1, 32], strides = [1, 1]} : vector<2x32xf32> to vector<1x32xf32>
    %127 = vector.extract_strided_slice %125 {offsets = [1, 0], sizes = [1, 32], strides = [1, 1]} : vector<2x32xf32> to vector<1x32xf32>
    %cst_62 = arith.constant 0.176776692 : f32
    %128 = vector.broadcast %cst_62 : f32 to vector<16x32xf32>
    %129 = arith.mulf %117, %128 : vector<16x32xf32>
    %cst_63 = arith.constant dense<0.000000e+00> : vector<16x8xf32>
    %130 = tpu.matmul %129, %115, %cst_63 {dimension_numbers = #tpu.dot_dimension_numbers<[1], [1], [0], [0], [0, 0, 1, 0], [], []>} : vector<16x32xf32>, vector<8x32xf32>, vector<16x8xf32> -> vector<16x8xf32>
    %131 = vector.broadcast %122 : vector<1x8xf32> to vector<16x8xf32>
    %132 = arith.addf %130, %131 : vector<16x8xf32>
    %cst_64 = arith.constant dense<0xFF800000> : vector<16xf32>
    %133 = vector.multi_reduction <maximumf>, %132, %cst_64 [1] : vector<16x8xf32> to vector<16xf32>
    %134 = vector.shape_cast %133 : vector<16xf32> to vector<16x1xf32>
    %135 = vector.broadcast %134 : vector<16x1xf32> to vector<16x8xf32>
    %136 = arith.subf %132, %135 : vector<16x8xf32>
    %137 = math.exp %136 : vector<16x8xf32>
    %cst_65 = arith.constant dense<0.000000e+00> : vector<16xf32>
    %138 = vector.multi_reduction <add>, %137, %cst_65 [1] : vector<16x8xf32> to vector<16xf32>
    %139 = vector.shape_cast %138 : vector<16xf32> to vector<16x1xf32>
    %140 = tpu.reciprocal %139 {approx = true} : vector<16x1xf32> -> vector<16x1xf32>
    %141 = vector.broadcast %140 : vector<16x1xf32> to vector<16x8xf32>
    %142 = arith.mulf %137, %141 : vector<16x8xf32>
    %cst_66 = arith.constant dense<0.000000e+00> : vector<16x32xf32>
    %143 = tpu.matmul %142, %115, %cst_66 {dimension_numbers = #tpu.dot_dimension_numbers<[1], [0], [0], [1], [0, 0, 1, 1], [], []>} : vector<16x8xf32>, vector<8x32xf32>, vector<16x32xf32> -> vector<16x32xf32>
    %cst_67 = arith.constant 0.176776692 : f32
    %144 = vector.broadcast %cst_67 : f32 to vector<8x32xf32>
    %145 = arith.mulf %115, %144 : vector<8x32xf32>
    %cst_68 = arith.constant dense<0.000000e+00> : vector<8x16xf32>
    %146 = tpu.matmul %145, %143, %cst_68 {dimension_numbers = #tpu.dot_dimension_numbers<[1], [1], [0], [0], [0, 0, 1, 0], [], []>} : vector<8x32xf32>, vector<16x32xf32>, vector<8x16xf32> -> vector<8x16xf32>
    %cst_69 = arith.constant dense<0xFF800000> : vector<8xf32>
    %147 = vector.multi_reduction <maximumf>, %146, %cst_69 [1] : vector<8x16xf32> to vector<8xf32>
    %148 = vector.shape_cast %147 : vector<8xf32> to vector<8x1xf32>
    %149 = vector.broadcast %148 : vector<8x1xf32> to vector<8x16xf32>
    %150 = arith.subf %146, %149 : vector<8x16xf32>
    %151 = math.exp %150 : vector<8x16xf32>
    %cst_70 = arith.constant dense<0.000000e+00> : vector<8xf32>
    %152 = vector.multi_reduction <add>, %151, %cst_70 [1] : vector<8x16xf32> to vector<8xf32>
    %153 = vector.shape_cast %152 : vector<8xf32> to vector<8x1xf32>
    %154 = tpu.reciprocal %153 {approx = true} : vector<8x1xf32> -> vector<8x1xf32>
    %155 = vector.broadcast %154 : vector<8x1xf32> to vector<8x16xf32>
    %156 = arith.mulf %151, %155 : vector<8x16xf32>
    %cst_71 = arith.constant dense<0.000000e+00> : vector<8x32xf32>
    %157 = tpu.matmul %156, %143, %cst_71 {dimension_numbers = #tpu.dot_dimension_numbers<[1], [0], [0], [1], [0, 0, 1, 1], [], []>} : vector<8x16xf32>, vector<16x32xf32>, vector<8x32xf32> -> vector<8x32xf32>
    %cst_72 = arith.constant dense<0.000000e+00> : vector<32xf32>
    %158 = vector.multi_reduction <add>, %143, %cst_72 [0] : vector<16x32xf32> to vector<32xf32>
    %159 = vector.shape_cast %158 : vector<32xf32> to vector<1x32xf32>
    %cst_73 = arith.constant 1.600000e+01 : f32
    %160 = vector.broadcast %cst_73 : f32 to vector<1x32xf32>
    %161 = arith.divf %159, %160 : vector<1x32xf32>
    %cst_74 = arith.constant dense<0.000000e+00> : vector<32xf32>
    %162 = vector.multi_reduction <add>, %157, %cst_74 [0] : vector<8x32xf32> to vector<32xf32>
    %163 = vector.shape_cast %162 : vector<32xf32> to vector<1x32xf32>
    %cst_75 = arith.constant 8.000000e+00 : f32
    %164 = vector.broadcast %cst_75 : f32 to vector<1x32xf32>
    %165 = arith.divf %163, %164 : vector<1x32xf32>
    %166 = arith.addf %161, %165 : vector<1x32xf32>
    %cst_76 = arith.constant dense<0.000000e+00> : vector<1x32xf32>
    %167 = tpu.matmul %166, %38, %cst_76 {dimension_numbers = #tpu.dot_dimension_numbers<[1], [0], [0], [1], [0, 0, 1, 1], [], []>} : vector<1x32xf32>, vector<32x32xf32>, vector<1x32xf32> -> vector<1x32xf32>
    %cst_77 = arith.constant dense<0.000000e+00> : vector<1x32xf32>
    %168 = tpu.matmul %126, %39, %cst_77 {dimension_numbers = #tpu.dot_dimension_numbers<[1], [0], [0], [1], [0, 0, 1, 1], [], []>} : vector<1x32xf32>, vector<32x32xf32>, vector<1x32xf32> -> vector<1x32xf32>
    %169 = arith.addf %167, %168 : vector<1x32xf32>
    %170 = arith.addf %169, %40 : vector<1x32xf32>
    %171 = math.tanh %170 : vector<1x32xf32>
    %172 = arith.addf %166, %171 : vector<1x32xf32>
    %173 = arith.addf %172, %127 : vector<1x32xf32>
    %cst_78 = arith.constant 0.176776692 : f32
    %174 = vector.broadcast %cst_78 : f32 to vector<1x32xf32>
    %175 = arith.mulf %173, %174 : vector<1x32xf32>
    %cst_79 = arith.constant dense<0.000000e+00> : vector<1x8xf32>
    %176 = tpu.matmul %175, %119, %cst_79 {dimension_numbers = #tpu.dot_dimension_numbers<[1], [1], [0], [0], [0, 0, 1, 0], [], []>} : vector<1x32xf32>, vector<8x32xf32>, vector<1x8xf32> -> vector<1x8xf32>
    %177 = arith.addf %176, %123 : vector<1x8xf32>
    %cst_80 = arith.constant dense<0xFF800000> : vector<1xf32>
    %178 = vector.multi_reduction <maximumf>, %177, %cst_80 [1] : vector<1x8xf32> to vector<1xf32>
    %179 = vector.shape_cast %178 : vector<1xf32> to vector<1x1xf32>
    %180 = vector.broadcast %179 : vector<1x1xf32> to vector<1x8xf32>
    %181 = arith.subf %177, %180 : vector<1x8xf32>
    %182 = math.exp %181 : vector<1x8xf32>
    %cst_81 = arith.constant dense<0.000000e+00> : vector<1xf32>
    %183 = vector.multi_reduction <add>, %182, %cst_81 [1] : vector<1x8xf32> to vector<1xf32>
    %184 = vector.shape_cast %183 : vector<1xf32> to vector<1x1xf32>
    %185 = tpu.reciprocal %184 {approx = true} : vector<1x1xf32> -> vector<1x1xf32>
    %186 = vector.broadcast %185 : vector<1x1xf32> to vector<1x8xf32>
    %187 = arith.mulf %182, %186 : vector<1x8xf32>
    %cst_82 = arith.constant dense<0.000000e+00> : vector<1x32xf32>
    %188 = tpu.matmul %187, %119, %cst_82 {dimension_numbers = #tpu.dot_dimension_numbers<[1], [0], [0], [1], [0, 0, 1, 1], [], []>} : vector<1x8xf32>, vector<8x32xf32>, vector<1x32xf32> -> vector<1x32xf32>
    %189 = tpu.concatenate %97, %114, %171, %188 in 1 : vector<1x32xf32>, vector<1x32xf32>, vector<1x32xf32>, vector<1x32xf32> -> vector<1x128xf32>
    %c0_83 = arith.constant 0 : index
    %c0_84 = arith.constant 0 : index
    %190 = vector.load %arg10[%c0_83, %c0_84] : memref<1x128xf32, #tpu.memory_space<vmem>>, vector<1x128xf32>
    tpu.vector_store %arg10[%c0_83, %c0_84], %189 {strides = array<i32>} : memref<1x128xf32, #tpu.memory_space<vmem>>, vector<1x128xf32>,
    return
  }
  func.func @transform_0(%arg0: i32) -> (i32, i32, i32) {
    %c0_i32 = arith.constant 0 : i32
    %c0_i32_0 = arith.constant 0 : i32
    %c0_i32_1 = arith.constant 0 : i32
    %c0_i32_2 = arith.constant 0 : i32
    return %c0_i32, %c0_i32_0, %c0_i32_1 : i32, i32, i32
  }
  func.func @transform_1(%arg0: i32) -> (i32, i32, i32) {
    %c0_i32 = arith.constant 0 : i32
    %c0_i32_0 = arith.constant 0 : i32
    %c0_i32_1 = arith.constant 0 : i32
    %c0_i32_2 = arith.constant 0 : i32
    return %c0_i32, %c0_i32_0, %c0_i32_1 : i32, i32, i32
  }
  func.func @transform_2(%arg0: i32) -> (i32, i32, i32) {
    %c0_i32 = arith.constant 0 : i32
    %c0_i32_0 = arith.constant 0 : i32
    %c0_i32_1 = arith.constant 0 : i32
    %c0_i32_2 = arith.constant 0 : i32
    return %c0_i32, %c0_i32_0, %c0_i32_1 : i32, i32, i32
  }
  func.func @transform_3(%arg0: i32) -> (i32, i32, i32) {
    %c0_i32 = arith.constant 0 : i32
    %c0_i32_0 = arith.constant 0 : i32
    %c0_i32_1 = arith.constant 0 : i32
    %c0_i32_2 = arith.constant 0 : i32
    return %c0_i32, %c0_i32_0, %c0_i32_1 : i32, i32, i32
  }
  func.func @transform_4(%arg0: i32) -> (i32, i32, i32) {
    %c0_i32 = arith.constant 0 : i32
    %c0_i32_0 = arith.constant 0 : i32
    %c0_i32_1 = arith.constant 0 : i32
    %c0_i32_2 = arith.constant 0 : i32
    return %c0_i32, %c0_i32_0, %c0_i32_1 : i32, i32, i32
  }
  func.func @transform_5(%arg0: i32) -> (i32, i32) {
    %c0_i32 = arith.constant 0 : i32
    %c0_i32_0 = arith.constant 0 : i32
    %c0_i32_1 = arith.constant 0 : i32
    return %c0_i32, %c0_i32_0 : i32, i32
  }
  func.func @transform_6(%arg0: i32) -> (i32, i32) {
    %c0_i32 = arith.constant 0 : i32
    %c0_i32_0 = arith.constant 0 : i32
    %c0_i32_1 = arith.constant 0 : i32
    return %c0_i32, %c0_i32_0 : i32, i32
  }
  func.func @transform_7(%arg0: i32) -> (i32, i32) {
    %c0_i32 = arith.constant 0 : i32
    %c0_i32_0 = arith.constant 0 : i32
    %c0_i32_1 = arith.constant 0 : i32
    return %c0_i32, %c0_i32_0 : i32, i32
  }
  func.func @transform_8(%arg0: i32) -> (i32, i32) {
    %c0_i32 = arith.constant 0 : i32
    %c0_i32_0 = arith.constant 0 : i32
    %c0_i32_1 = arith.constant 0 : i32
    return %c0_i32, %c0_i32_0 : i32, i32
  }
  func.func @transform_9(%arg0: i32) -> (i32, i32) {
    %c0_i32 = arith.constant 0 : i32
    %c0_i32_0 = arith.constant 0 : i32
    %c0_i32_1 = arith.constant 0 : i32
    return %c0_i32, %c0_i32_0 : i32, i32
  }
}

</mosaic_0001>

<bundles_post_ra>
// kernel: phrase_layer_forward.1
= control target key start
LH: loop header
LB: loop body
LE: loop exit
PB: predicated region body
PF: predicated region fallthrough
CT: control target
= control target key end

     0   :  { %14 = vsyncpa [#allocation3], 0  ;;  %s1305_s0 = inlined_call_operand.hbm [shape: f32[2,8,32], index: 0, kind: input, shape index: {}]   ;;  %s1306_s1 = inlined_call_operand.hbm [shape: f32[2,16,32], index: 1, kind: input, shape index: {}]   ;;  %s1307_s2 = inlined_call_operand.hbm [shape: f32[2,8,32], index: 2, kind: input, shape index: {}]   ;;  %s1308_s3 = inlined_call_operand.vmem [shape: f32[2,2,32], index: 3, kind: input, shape index: {}]   ;;  %s1309_s4 = inlined_call_operand.vmem [shape: f32[2,1,16], index: 4, kind: input, shape index: {}]   ;;  %s1310_s5 = inlined_call_operand.vmem [shape: f32[96,32], index: 5, kind: input, shape index: {}]   ;;  %s1311_s6 = inlined_call_operand.vmem [shape: f32[1,32], index: 6, kind: input, shape index: {}]   ;;  %s1312_s7 = inlined_call_operand.vmem [shape: f32[64,32], index: 7, kind: input, shape index: {}]   ;;  %s1313_s8 = inlined_call_operand.vmem [shape: f32[1,32], index: 8, kind: input, shape index: {}]   ;;  %s1314_s9 = inlined_call_operand.vmem [shape: f32[1,128], index: 9, kind: output, shape index: {}]  }
   0x1   :  { %15 = vsyncpa [#allocation5], 0  ;;  %s33_s11 = sshll.u32 %s1306_s1, 4  ;;  %s994_s12 = smov [#allocation4]   ;;  %s34_s11 = int_to_ptr.hbm [resolvable:$true] %s33_s11 }
   0x2   :  { %s35_s13 = sshll.u32 %s994_s12, 4  ;;  %s20_s16 = sshll.u32 %s1305_s0, 4  ;;  %s36_s13 = int_to_ptr.vmem [resolvable:$true] %s35_s13  ;;  %s21_s16 = int_to_ptr.hbm [resolvable:$true] %s20_s16 }
   0x3   :  { %s995_s17 = smov 128   ;;  %s996_s18 = smov 8  }
   0x4   :  { %41 = dma.hbm_to_vmem [thread:$0]  %s34_s11, 512, %s36_s13, [#allocation5], %s995_s17, %s995_s17, %s996_s18  }
   0x5   :  { %s997_s19 = smov [#allocation2]   ;;  %s46_s23 = sshll.u32 %s1307_s2, 4  ;;  %s47_s23 = int_to_ptr.hbm [resolvable:$true] %s46_s23 }
   0x6   :  { %s22_s20 = sshll.u32 %s997_s19, 4  ;;  %s998_s1 = smov [#allocation6]   ;;  %s23_s20 = int_to_ptr.vmem [resolvable:$true] %s22_s20 }
   0x7   :  { %28 = dma.hbm_to_vmem [thread:$0]  %s21_s16, 256, %s23_s20, [#allocation3], %s995_s17, %s995_s17, %s996_s18  }
   0x8   :  { %s48_s24 = sshll.u32 %s998_s1, 4  ;;  %s49_s24 = int_to_ptr.vmem [resolvable:$true] %s48_s24 }
   0x9   :  { %54 = dma.hbm_to_vmem [thread:$0]  %s47_s23, 256, %s49_s24, [#allocation5], %s995_s17, %s995_s17, %s996_s18  }
   0xa   :  { %990 = dma.done.wait [#allocation3], 256  }
   0xb   :  { %991 = vsyncadd [#allocation3], 4294967040 }
   0xc   :  { %992 = dma.done.wait [#allocation5], 768  }
   0xd   :  { %993 = vsyncadd [#allocation5], 4294966528  ;;  %v81_v0 = vlaneseq  ;;  %v1067_v3 = vld [vmem:[#allocation2] sm:$0xff]  ;;  %v1069_v4 = vld [vmem:[#allocation2 + $0x8] sm:$0xff]  ;;  %s999_s25 = smov 32   ;;  %s1000_s15 = smov 64  }
   0xe   :  { %v159_v5 = vld [vmem:[%s1310_s5 + $0x58] sm:$0xff]  ;;  %128 = vrot.lane.b32.xlu0 %v1067_v3, %s999_s25  ;;  %v119_v6 = vrot.slane %v1067_v3, 1  ;;  %v120_v7 = vrot.slane %v1069_v4, 1  ;;  %v158_v8 = vld [vmem:[%s1310_s5 + $0x50] sm:$0xff]  ;;  %v157_v9 = vld [vmem:[%s1310_s5 + $0x48] sm:$0xff]  ;;  %v110_v21 = vrot.slane %v1067_v3, 7 }
   0xf   :  { %v1064_v1 = vshrl.u32 %v81_v0, 7  ;;  %175 = vmatpush.msra.mxu0 %v159_v5  ;;  %v156_v11 = vld [vmem:[%s1310_s5 + $0x40] sm:$0xff]  ;;  %v155_v13 = vld [vmem:[%s1310_s5 + $0x38] sm:$0xff]  ;;  %v154_v14 = vld [vmem:[%s1310_s5 + $0x30] sm:$0xff]  ;;  %v111_v22 = vrot.slane %v1069_v4, 7  ;;  %vm142_vm4 = vcmask 261120  }
  0x10   :  { %v153_v15 = vld [vmem:[%s1310_s5 + $0x28] sm:$0xff]  ;;  %v152_v16 = vld [vmem:[%s1310_s5 + $0x20] sm:$0xff]  ;;  %v151_v17 = vld [vmem:[%s1310_s5 + $0x18] sm:$0xff]  ;;  %vm145_vm5 = vcmask 523264   ;;  %vm164_vm6 = vcmask 785408   ;;  %vm247_vm7 = vcmask 64512  }
  0x11   :  { %v88_v2 = vand.u32 7, %v1064_v1  ;;  %vm121_vm0 = vcmp.lt.s32.totalorder %v1064_v1, 7  ;;  %176 = vmatpush.msra.mxu0 %v158_v8  ;;  %v150_v18 = vld [vmem:[%s1310_s5 + $0x10] sm:$0xff]  ;;  %v149_v19 = vld [vmem:[%s1310_s5 + $0x8] sm:$0xff]  ;;  %v148_v20 = vld [vmem:[%s1310_s5] sm:$0xff]  ;;  %vm112_vm2 = vcmp.lt.s32.totalorder %v1064_v1, 1 }
  0x12   :  { %v122_v10 = vsel %vm121_vm0, %v119_v6, %v120_v7  ;;  %v114_v24 = vsel %vm112_vm2, %v111_v22, %v110_v21  ;;  %v1134_v29 = vld [vmem:[%s1311_s6] ss:$0 sm:$0xff]  ;;  %v205_v32 = vld [vmem:[#allocation4] sm:$0xff]  ;;  %v206_v35 = vld [vmem:[#allocation4 + $0x8] sm:$0xff]  ;;  %vm329_vm8 = vcmask 130048   ;;  %vm479_vm13 = vcmask 57344  }
  0x13   :  { %vm117_vm1 = vcmp.eq.s32.totalorder %v88_v2, 7  ;;  %177 = vmatpush.msra.mxu0 %v157_v9  ;;  %vm108_vm3 = vcmp.eq.s32.totalorder %v88_v2, 0  ;;  %v210_v34 = vmul.f32 0.17677669, %v205_v32  ;;  %v211_v36 = vmul.f32 0.17677669, %v206_v35 }
  0x14   :  { %v124_v12 = vsel %vm117_vm1, 0.0, %v122_v10  ;;  %v115_v25 = vsel %vm108_vm3, 0.0, %v114_v24  ;;  %v1143_v37 = vld [vmem:[%s1309_s4] ss:$0 sm:$0xff]  ;;  %v1181_v24 = vld [vmem:[%s1312_s7 + $0x38] sm:$0xff]  ;;  %v1193_v3 = vld [vmem:[%s1312_s7 + $0x28] sm:$0xff] }
  0x15   :  { %178 = vmatpush.msra.mxu0 %v156_v11  ;;  %v83_v11 = vadd.s32 8, %v1064_v1  ;;  %v1187_v1 = vld [vmem:[%s1312_s7 + $0x30] sm:$0xff]  ;;  %v1001_v32 = vmov 16.0  }
  0x16   :  { %136 = vrot.lane.b32.xlu0 %v124_v12, %s1000_s15 }
  0x17   :  { %179 = vmatpush.msra.mxu0 %v155_v13  ;;  %v95_v12 = vand.u32 7, %v83_v11  ;;  %v123_v13 = vsel %vm121_vm0, %v120_v7, %v119_v6 }
  0x19   :  { %180 = vmatpush.msra.mxu0 %v154_v14  ;;  %vm118_vm9 = vcmp.eq.s32.totalorder %v95_v12, 7  ;;  %vm109_vm10 = vcmp.eq.s32.totalorder %v95_v12, 0 }
  0x1a   :  { %v125_v14 = vsel %vm118_vm9, 0.0, %v123_v13  ;;  %v1243_v13 = vld [vmem:[%s1313_s8] sm:$0x1] }
  0x1b   :  { %181 = vmatpush.msra.mxu0 %v153_v15 }
  0x1d   :  { %182 = vmatpush.msra.mxu0 %v152_v16 }
  0x1f   :  { %183 = vmatpush.msra.mxu0 %v151_v17 }
  0x21   :  { %184 = vmatpush.msra.mxu0 %v150_v18  ;;  %v113_v18 = vsel %vm112_vm2, %v110_v21, %v111_v22  ;;  %v1202_v21 = vld [vmem:[%s1312_s7 + $0x20] sm:$0xff] }
  0x22   :  { %v1208_v22 = vld [vmem:[%s1308_s3] sm:$0x3] }
  0x23   :  { %185 = vmatpush.msra.mxu0 %v149_v19 }
  0x25   :  { %186 = vmatpush.msra.mxu0 %v148_v20  ;;  %v116_v20 = vsel %vm109_vm10, 0.0, %v113_v18 }
  0x80   :  { %v129_v23 = vpop.permute.xlu0 %128 }
  0x81   :  { %v143_v26 = vsel %vm142_vm4, %v115_v25, %v129_v23  ;;  %v198_v25 = vld [vmem:[%s1312_s7 + $0x10] sm:$0xff] }
  0x88   :  { %v137_v27 = vpop.permute.xlu0 %136 }
  0x89   :  { %v146_v28 = vsel %vm145_vm5, %v143_v26, %v137_v27  ;;  %v197_v26 = vld [vmem:[%s1312_s7 + $0x8] sm:$0xff] }
  0x8a   :  { %832 = vmatmul.msk.f32.vlgmr.msra.gmra.mxu0 %vm164_vm6, %v146_v28  ;;  %v196_v28 = vld [vmem:[%s1312_s7] sm:$0xff] }
 0x107   :  { %v188_v30 = vpop.f32.mrf.mxu0 }
 0x108   :  { %v189_v31 = vadd.f32 %v1134_v29, %v188_v30  ;;  %v207_v30 = vld [vmem:[#allocation6] sm:$0xff] }
 0x10a   :  { %v194_v33 = vmax.f32 %v189_v31, 0.0 }
 0x10c   :  { %834 = vmatpush.xpose.msk.msra.mxu1 %vm142_vm4, %v194_v33  ;;  %291 = vmatpush.msra.mxu2 %v194_v33  ;;  %v299_v62 = vmul.f32 0.17677669, %v194_v33 }
 0x10e   :  { %412 = vmatpush.msrb.mxu2 %v1181_v24 }
 0x10f   :  { %835 = vmatmul.msk.f32.vlgmr.msra.gmra.mxu1 %vm142_vm4, %v210_v34  ;;  %v1002_v34 = vmov 8.0  }
 0x110   :  { %413 = vmatpush.msrb.mxu2 %v1187_v1 }
 0x112   :  { %414 = vmatpush.msrb.mxu2 %v1193_v3 }
 0x114   :  { %415 = vmatpush.msrb.mxu2 %v1202_v21 }
 0x117   :  { %836 = vmatmul.msk.f32.gmra.mxu1 %vm142_vm4, %v211_v36 }
 0x18c   :  { %v241_v38 = vpop.f32.mrf.mxu1 }
 0x18d   :  { %v242_v39 = vadd.f32 %v1143_v37, %v241_v38 }
 0x18f   :  { %v248_v40 = vsel %vm247_vm7, %v242_v39, -inf }
 0x190   :  { %249 = vmax.xlane.f32.xlu1 %v248_v40 }
 0x194   :  { %v244_v41 = vpop.f32.mrf.mxu1 }
 0x195   :  { %v245_v42 = vadd.f32 %v1143_v37, %v244_v41 }
 0x197   :  { %v251_v43 = vsel %vm247_vm7, %v245_v42, -inf }
 0x198   :  { %252 = vmax.xlane.f32.xlu1 %v251_v43 }
 0x203   :  { %v250_v44 = vpop.xlane.xlu1 %249 }
 0x204   :  { %v254_v45 = vsub.f32 %v242_v39, %v250_v44 }
 0x206   :  { %v256_v46 = vmul.f32 1.442695, %v254_v45 }
 0x208   :  { %878 = vpow2.f32 %v256_v46 }
 0x20b   :  { %v253_v47 = vpop.xlane.xlu1 %252 }
 0x20c   :  { %v255_v48 = vsub.f32 %v245_v42, %v253_v47 }
 0x20e   :  { %v879_v49 = vpop.eup %878  ;;  %v258_v50 = vmul.f32 1.442695, %v255_v48 }
 0x20f   :  { %v260_v51 = vsel %vm247_vm7, %v879_v49, 0.0 }
 0x210   :  { %880 = vpow2.f32 %v258_v50  ;;  %261 = vadd.xlane.f32.xlu2 %v260_v51 }
 0x216   :  { %v881_v52 = vpop.eup %880 }
 0x217   :  { %v263_v53 = vsel %vm247_vm7, %v881_v52, 0.0 }
 0x218   :  { %264 = vadd.xlane.f32.xlu2 %v263_v53 }
 0x230   :  { %130 = vrot.lane.b32.xlu2 %v1069_v4, %s999_s25  ;;  %v199_v4 = vld [vmem:[%s1312_s7 + $0x18] sm:$0xff] }
 0x231   :  { %435 = vmatpush.msrb.mxu1 %v199_v4 }
 0x233   :  { %436 = vmatpush.msrb.mxu1 %v198_v25 }
 0x235   :  { %437 = vmatpush.msrb.mxu1 %v197_v26 }
 0x237   :  { %438 = vmatpush.msrb.mxu1 %v196_v28 }
 0x283   :  { %v262_v54 = vpop.xlane.xlu2 %261 }
 0x284   :  { %882 = vrcp.f32 %v262_v54 }
 0x28a   :  { %v883_v55 = vpop.eup %882 }
 0x28b   :  { %v265_v56 = vpop.xlane.xlu2 %264  ;;  %v268_v57 = vmul.f32 %v883_v55, %v879_v49 }
 0x28c   :  { %884 = vrcp.f32 %v265_v56 }
 0x28d   :  { %837 = vmatmul.msk.f32.vlgmr.msra.gmra.mxu2 %vm247_vm7, %v268_v57 }
 0x28e   :  { %509 = vmatpush.msra.mxu2 %v207_v30 }
 0x292   :  { %v885_v58 = vpop.eup %884 }
 0x293   :  { %v269_v59 = vmul.f32 %v885_v58, %v881_v52  ;;  %v131_v19 = vpop.permute.xlu2 %130 }
 0x294   :  { %v144_v6 = vsel %vm142_vm4, %v116_v20, %v131_v19  ;;  %v446_v20 = vrot.slane %v1208_v22, 1 }
 0x295   :  { %838 = vmatmul.msk.f32.gmra.mxu2 %vm247_vm7, %v269_v59 }
 0x29d   :  { %843 = vmatmul.msk.f32.vlgmr.msrb.gmra.mxu2 %vm142_vm4, %v1208_v22 }
 0x310   :  { %v293_v60 = vpop.f32.mrf.mxu2 }
 0x311   :  { %v364_v31 = vsel %vm142_vm4, %v293_v60, 0.0 }
 0x318   :  { %v296_v61 = vpop.f32.mrf.mxu2 }
 0x319   :  { %839 = vmatpush.xpose.msk.msra.mxu3 %vm142_vm4, %v296_v61  ;;  %v365_v27 = vsel %vm142_vm4, %v296_v61, 0.0 }
 0x31a   :  { %v366_v33 = vadd.f32 %v365_v27, %v364_v31 }
 0x31c   :  { %v367_v35 = vrot.slane %v366_v33, 4 }
 0x31d   :  { %840 = vmatpush.xpose.msk.msra.mxu3 %vm142_vm4, %v293_v60 }
 0x31e   :  { %v368_v39 = vadd.f32 %v367_v35, %v366_v33 }
 0x320   :  { %841 = vmatmul.msk.f32.vlgmr.msra.gmra.mxu3 %vm142_vm4, %v299_v62  ;;  %v369_v42 = vrot.slane %v368_v39, 2  ;;  %v417_v12 = vpop.f32.mrf.mxu2 }
 0x321   :  { %358 = vmatpush.msrb.mxu3 %v296_v61 }
 0x322   :  { %v370_v47 = vadd.f32 %v369_v42, %v368_v39 }
 0x323   :  { %359 = vmatpush.msrb.mxu3 %v293_v60 }
 0x324   :  { %v371_v52 = vrot.slane %v370_v47, 1 }
 0x325   :  { %845 = vmatpush.xpose.msk.msra.mxu3 %vm142_vm4, %v207_v30 }
 0x326   :  { %v372_v57 = vadd.f32 %v371_v52, %v370_v47 }
 0x3a3   :  { %v326_v63 = vpop.f32.mrf.mxu3 }
 0x3a4   :  { %v330_v0 = vsel %vm329_vm8, %v326_v63, -inf }
 0x3a5   :  { %331 = vmax.xlane.f32.xlu0 %v330_v0 }
 0x418   :  { %v332_v2 = vpop.xlane.xlu0 %331 }
 0x419   :  { %v333_v5 = vsub.f32 %v326_v63, %v332_v2 }
 0x41b   :  { %v334_v8 = vmul.f32 1.442695, %v333_v5 }
 0x41d   :  { %886 = vpow2.f32 %v334_v8 }
 0x423   :  { %v887_v9 = vpop.eup %886 }
 0x424   :  { %v336_v10 = vsel %vm329_vm8, %v887_v9, 0.0 }
 0x425   :  { %337 = vadd.xlane.f32.xlu1 %v336_v10  ;;  %v516_v10 = vld [vmem:[#allocation4 + $0x18] sm:$0xff] }
 0x426   :  { %v524_v11 = vmul.f32 0.17677669, %v516_v10 }
 0x43e   :  { %138 = vrot.lane.b32.xlu1 %v125_v14, %s1000_s15 }
 0x498   :  { %v338_v15 = vpop.xlane.xlu1 %337 }
 0x499   :  { %888 = vrcp.f32 %v338_v15 }
 0x49a   :  { %890 = vrcp.f32 %v1001_v32 }
 0x49b   :  { %892 = vrcp.f32 %v1002_v34 }
 0x49f   :  { %v889_v16 = vpop.eup %888 }
 0x4a0   :  { %v340_v17 = vmul.f32 %v889_v16, %v887_v9  ;;  %v891_v36 = vpop.eup %890  ;;  %v515_v9 = vld [vmem:[#allocation4 + $0x10] sm:$0xff] }
 0x4a1   :  { %v893_v38 = vpop.eup %892  ;;  %v374_v41 = vmul.f32 16.0, %v891_v36  ;;  %vm378_vm12 = vweird.f32 %v891_v36 }
 0x4a2   :  { %842 = vmatmul.msk.f32.vlgmr.msrb.gmra.mxu3 %vm329_vm8, %v340_v17  ;;  %v389_v40 = vmul.f32 8.0, %v893_v38  ;;  %vm393_vm11 = vweird.f32 %v893_v38  ;;  %v877_v17 = vld [vmem:[%s1309_s4 + $0x1] ss:$0 sm:$0xff]  ;;  %s1003_s4 = smov 120  }
 0x4a3   :  { %v375_v44 = vsub.f32 1.0, %v374_v41 }
 0x4a4   :  { %v390_v43 = vsub.f32 1.0, %v389_v40 }
 0x4a5   :  { %v376_v50 = vmul.f32 %v891_v36, %v375_v44 }
 0x4a6   :  { %v391_v49 = vmul.f32 %v893_v38, %v390_v43 }
 0x4a7   :  { %v377_v55 = vadd.f32 %v891_v36, %v376_v50 }
 0x4a8   :  { %v392_v54 = vadd.f32 %v893_v38, %v391_v49 }
 0x4a9   :  { %v1228_v62 = vsel %vm378_vm12, %v891_v36, %v377_v55 }
 0x4aa   :  { %v1225_v60 = vsel %vm393_vm11, %v893_v38, %v392_v54  ;;  %v380_v5 = vmul.f32 %v1228_v62, %v372_v57 }
 0x4b0   :  { %v139_v7 = vpop.permute.xlu1 %138 }
 0x4b1   :  { %v147_v23 = vsel %vm145_vm5, %v144_v6, %v139_v7 }
 0x4b2   :  { %833 = vmatmul.msk.f32.gmra.mxu0 %vm164_vm6, %v147_v23 }
 0x525   :  { %v361_v45 = vpop.f32.mrf.mxu3 }
 0x526   :  { %v381_v46 = vsel %vm142_vm4, %v361_v45, 0.0 }
 0x527   :  { %v382_v48 = vrot.slane %v381_v46, 4 }
 0x529   :  { %v383_v51 = vadd.f32 %v382_v48, %v381_v46 }
 0x52b   :  { %v384_v53 = vrot.slane %v383_v51, 2 }
 0x52d   :  { %v385_v56 = vadd.f32 %v384_v53, %v383_v51 }
 0x52f   :  { %v386_v58 = vrot.slane %v385_v56, 1  ;;  %v191_v59 = vpop.f32.mrf.mxu0 }
 0x530   :  { %v192_v61 = vadd.f32 %v1134_v29, %v191_v59  ;;  %v523_v29 = vmul.f32 0.17677669, %v515_v9 }
 0x531   :  { %v387_v63 = vadd.f32 %v386_v58, %v385_v56 }
 0x532   :  { %v1230_v0 = vmax.f32 %v192_v61, 0.0 }
 0x533   :  { %v395_v2 = vmul.f32 %v1225_v60, %v387_v63 }
 0x534   :  { %850 = vmatpush.xpose.msk.msra.mxu1 %vm142_vm4, %v1230_v0  ;;  %603 = vmatpush.msrb.mxu3 %v1230_v0  ;;  %v611_v59 = vmul.f32 0.17677669, %v1230_v0 }
 0x535   :  { %v396_v8 = vadd.f32 %v395_v2, %v380_v5 }
 0x537   :  { %844 = vmatmul.msk.f32.vlgmr.msrb.gmra.mxu1 %vm142_vm4, %v396_v8 }
 0x538   :  { %732 = vmatpush.msrb.mxu1 %v199_v4 }
 0x53a   :  { %733 = vmatpush.msrb.mxu1 %v198_v25 }
 0x53c   :  { %734 = vmatpush.msrb.mxu1 %v197_v26 }
 0x53e   :  { %735 = vmatpush.msrb.mxu1 %v196_v28 }
 0x53f   :  { %851 = vmatmul.msk.f32.vlgmr.msra.gmra.mxu1 %vm142_vm4, %v523_v29  ;;  %v849_v29 = vld [vmem:[%s1308_s3 + $0x2] sm:$0x3]  ;;  %s1004_s3 = smov 96  }
 0x547   :  { %852 = vmatmul.msk.f32.gmra.mxu1 %vm142_vm4, %v524_v11 }
 0x5b4   :  { %v440_v14 = vpop.f32.mrf.mxu1 }
 0x5b5   :  { %v441_v15 = vadd.f32 %v440_v14, %v417_v12 }
 0x5b7   :  { %v443_v16 = vadd.f32 %v441_v15, %v1243_v13 }
 0x5b9   :  { %894 = vtanh.f32 %v443_v16 }
 0x5bc   :  { %v554_v18 = vpop.f32.mrf.mxu1 }
 0x5bd   :  { %v555_v19 = vadd.f32 %v877_v17, %v554_v18 }
 0x5bf   :  { %v1250_v6 = vpop.eup %894  ;;  %v560_v7 = vsel %vm247_vm7, %v555_v19, -inf }
 0x5c0   :  { %v445_v23 = vadd.f32 %v1250_v6, %v396_v8  ;;  %561 = vmax.xlane.f32.xlu2 %v560_v7 }
 0x5c2   :  { %v448_v4 = vadd.f32 %v446_v20, %v445_v23 }
 0x5c4   :  { %v557_v25 = vpop.f32.mrf.mxu1  ;;  %v449_v26 = vmul.f32 0.17677669, %v448_v4 }
 0x5c5   :  { %v558_v27 = vadd.f32 %v877_v17, %v557_v25 }
 0x5c6   :  { %846 = vmatmul.msk.f32.vlgmr.msra.gmra.mxu3 %vm142_vm4, %v449_v26 }
 0x5c7   :  { %v563_v28 = vsel %vm247_vm7, %v558_v27, -inf }
 0x5c8   :  { %564 = vmax.xlane.f32.xlu1 %v563_v28 }
 0x633   :  { %v562_v30 = vpop.xlane.xlu2 %561 }
 0x634   :  { %v566_v31 = vsub.f32 %v555_v19, %v562_v30 }
 0x636   :  { %v568_v32 = vmul.f32 1.442695, %v566_v31 }
 0x638   :  { %896 = vpow2.f32 %v568_v32 }
 0x63b   :  { %v565_v22 = vpop.xlane.xlu1 %564 }
 0x63c   :  { %v567_v33 = vsub.f32 %v558_v27, %v565_v22  ;;  %v518_v22 = vld [vmem:[#allocation6 + $0x8] sm:$0xff] }
 0x63d   :  { %805 = vmatpush.msra.mxu3 %v518_v22 }
 0x63e   :  { %v897_v34 = vpop.eup %896  ;;  %v570_v35 = vmul.f32 1.442695, %v567_v33 }
 0x63f   :  { %v572_v36 = vsel %vm247_vm7, %v897_v34, 0.0 }
 0x640   :  { %898 = vpow2.f32 %v570_v35  ;;  %573 = vadd.xlane.f32.xlu0 %v572_v36 }
 0x646   :  { %v899_v38 = vpop.eup %898 }
 0x647   :  { %v575_v39 = vsel %vm247_vm7, %v899_v38, 0.0 }
 0x648   :  { %576 = vadd.xlane.f32.xlu0 %v575_v39 }
 0x649   :  { %v476_v46 = vpop.f32.mrf.mxu3 }
 0x65c   :  { %450 = vrot.lane.b32.xlu0 %v1143_v37, %s1003_s4 }
 0x6b3   :  { %v574_v40 = vpop.xlane.xlu0 %573 }
 0x6b4   :  { %900 = vrcp.f32 %v574_v40 }
 0x6ba   :  { %v901_v41 = vpop.eup %900 }
 0x6bb   :  { %v580_v42 = vmul.f32 %v901_v41, %v897_v34  ;;  %v577_v43 = vpop.xlane.xlu0 %576 }
 0x6bc   :  { %902 = vrcp.f32 %v577_v43 }
 0x6bd   :  { %853 = vmatmul.msk.f32.vlgmr.msrb.gmra.mxu3 %vm247_vm7, %v580_v42 }
 0x6c2   :  { %v903_v44 = vpop.eup %902 }
 0x6c3   :  { %v581_v45 = vmul.f32 %v903_v44, %v899_v38  ;;  %v743_v38 = vrot.slane %v849_v29, 1 }
 0x6c5   :  { %854 = vmatmul.msk.f32.gmra.mxu3 %vm247_vm7, %v581_v45 }
 0x6ce   :  { %v451_v47 = vpop.permute.xlu0 %450 }
 0x6cf   :  { %v477_v48 = vadd.f32 %v476_v46, %v451_v47 }
 0x6d1   :  { %v480_v49 = vsel %vm479_vm13, %v477_v48, -inf }
 0x6d2   :  { %481 = vmax.xlane.f32.xlu2 %v480_v49 }
 0x740   :  { %v605_v37 = vpop.f32.mrf.mxu3 }
 0x741   :  { %v675_v11 = vsel %vm142_vm4, %v605_v37, 0.0 }
 0x745   :  { %v482_v50 = vpop.xlane.xlu2 %481 }
 0x746   :  { %v483_v51 = vsub.f32 %v477_v48, %v482_v50 }
 0x748   :  { %v484_v52 = vmul.f32 1.442695, %v483_v51  ;;  %v608_v53 = vpop.f32.mrf.mxu3 }
 0x749   :  { %855 = vmatpush.xpose.msk.msrb.mxu2 %vm142_vm4, %v608_v53  ;;  %669 = vmatpush.msrb.mxu0 %v608_v53  ;;  %v676_v10 = vsel %vm142_vm4, %v608_v53, 0.0 }
 0x74a   :  { %904 = vpow2.f32 %v484_v52  ;;  %v677_v12 = vadd.f32 %v676_v10, %v675_v11 }
 0x74b   :  { %670 = vmatpush.msrb.mxu0 %v605_v37 }
 0x74c   :  { %v678_v14 = vrot.slane %v677_v12, 4 }
 0x74d   :  { %856 = vmatpush.xpose.msk.msrb.mxu2 %vm142_vm4, %v605_v37  ;;  %861 = vmatpush.xpose.msk.msra.mxu0 %vm142_vm4, %v518_v22 }
 0x74e   :  { %v679_v15 = vadd.f32 %v678_v14, %v677_v12 }
 0x750   :  { %v905_v54 = vpop.eup %904  ;;  %v680_v16 = vrot.slane %v679_v15, 2 }
 0x751   :  { %v486_v55 = vsel %vm479_vm13, %v905_v54, 0.0 }
 0x752   :  { %487 = vadd.xlane.f32.xlu2 %v486_v55  ;;  %v681_v19 = vadd.f32 %v680_v16, %v679_v15 }
 0x754   :  { %v682_v23 = vrot.slane %v681_v19, 1 }
 0x756   :  { %v683_v26 = vadd.f32 %v682_v23, %v681_v19 }
 0x758   :  { %v684_v30 = vmul.f32 %v683_v26, %v1228_v62 }
 0x76a   :  { %747 = vrot.lane.b32.xlu2 %v877_v17, %s1003_s4 }
 0x7c5   :  { %v488_v56 = vpop.xlane.xlu2 %487 }
 0x7c6   :  { %906 = vrcp.f32 %v488_v56 }
 0x7cc   :  { %v907_v57 = vpop.eup %906 }
 0x7cd   :  { %v490_v58 = vmul.f32 %v907_v57, %v905_v54  ;;  %v748_v41 = vpop.permute.xlu2 %747 }
 0x7cf   :  { %847 = vmatmul.msk.f32.vlgmr.msra.gmra.mxu2 %vm247_vm7, %v490_v58 }
 0x7d0   :  { %709 = vmatpush.msra.mxu2 %v1181_v24 }
 0x7d2   :  { %710 = vmatpush.msra.mxu2 %v1187_v1 }
 0x7d4   :  { %711 = vmatpush.msra.mxu2 %v1193_v3 }
 0x7d6   :  { %712 = vmatpush.msra.mxu2 %v1202_v21 }
 0x7d7   :  { %857 = vmatmul.msk.f32.vlgmr.msrb.gmra.mxu2 %vm142_vm4, %v611_v59 }
 0x7df   :  { %859 = vmatmul.msk.f32.vlgmr.msra.gmra.mxu2 %vm142_vm4, %v849_v29 }
 0x852   :  { %v1274_v61 = vpop.f32.mrf.mxu2 }
 0x85a   :  { %v638_v63 = vpop.f32.mrf.mxu2 }
 0x85b   :  { %v641_v2 = vsel %vm329_vm8, %v638_v63, -inf }
 0x85c   :  { %642 = vmax.xlane.f32.xlu1 %v641_v2 }
 0x862   :  { %v714_v33 = vpop.f32.mrf.mxu2 }
 0x8cf   :  { %v643_v5 = vpop.xlane.xlu1 %642 }
 0x8d0   :  { %v644_v8 = vsub.f32 %v638_v63, %v643_v5 }
 0x8d2   :  { %v645_v9 = vmul.f32 1.442695, %v644_v8 }
 0x8d4   :  { %908 = vpow2.f32 %v645_v9 }
 0x8da   :  { %v909_v24 = vpop.eup %908 }
 0x8db   :  { %v647_v1 = vsel %vm329_vm8, %v909_v24, 0.0 }
 0x8dc   :  { %648 = vadd.xlane.f32.xlu0 %v647_v1 }
 0x94f   :  { %v649_v3 = vpop.xlane.xlu0 %648 }
 0x950   :  { %910 = vrcp.f32 %v649_v3 }
 0x956   :  { %v911_v0 = vpop.eup %910 }
 0x957   :  { %v651_v21 = vmul.f32 %v911_v0, %v909_v24 }
 0x959   :  { %858 = vmatmul.msk.f32.vlgmr.msrb.gmra.mxu0 %vm329_vm8, %v651_v21 }
 0x9d6   :  { %v672_v17 = vpop.f32.mrf.mxu0 }
 0x9d7   :  { %v685_v18 = vsel %vm142_vm4, %v672_v17, 0.0 }
 0x9d8   :  { %v686_v20 = vrot.slane %v685_v18, 4 }
 0x9da   :  { %v687_v7 = vadd.f32 %v686_v20, %v685_v18 }
 0x9dc   :  { %v688_v4 = vrot.slane %v687_v7, 2 }
 0x9de   :  { %v689_v25 = vadd.f32 %v688_v4, %v687_v7 }
 0x9e0   :  { %v690_v27 = vrot.slane %v689_v25, 1 }
 0x9e2   :  { %v691_v28 = vadd.f32 %v690_v27, %v689_v25 }
 0x9e4   :  { %v692_v31 = vmul.f32 %v691_v28, %v1225_v60 }
 0x9e6   :  { %v693_v32 = vadd.f32 %v692_v31, %v684_v30 }
 0x9e8   :  { %860 = vmatmul.msk.f32.vlgmr.msrb.gmra.mxu1 %vm142_vm4, %v693_v32 }
 0xa65   :  { %v737_v34 = vpop.f32.mrf.mxu1 }
 0xa66   :  { %v738_v35 = vadd.f32 %v737_v34, %v714_v33 }
 0xa68   :  { %v740_v36 = vadd.f32 %v738_v35, %v1243_v13 }
 0xa6a   :  { %912 = vtanh.f32 %v740_v36 }
 0xa70   :  { %v913_v39 = vpop.eup %912 }
 0xa71   :  { %v742_v40 = vadd.f32 %v913_v39, %v693_v32  ;;  %815 = vrot.lane.b32.xlu2 %v913_v39, %s1000_s15 }
 0xa73   :  { %v745_v62 = vadd.f32 %v743_v38, %v742_v40 }
 0xa75   :  { %v746_v60 = vmul.f32 0.17677669, %v745_v62 }
 0xa77   :  { %862 = vmatmul.msk.f32.vlgmr.msra.gmra.mxu0 %vm142_vm4, %v746_v60 }
 0xacb   :  { %v816_v52 = vpop.permute.xlu2 %815 }
 0xaf4   :  { %v773_v42 = vpop.f32.mrf.mxu0 }
 0xaf5   :  { %v774_v43 = vadd.f32 %v773_v42, %v748_v41 }
 0xaf7   :  { %v776_v44 = vsel %vm479_vm13, %v774_v43, -inf }
 0xaf8   :  { %777 = vmax.xlane.f32.xlu1 %v776_v44 }
 0xb6b   :  { %v778_v45 = vpop.xlane.xlu1 %777 }
 0xb6c   :  { %v779_v46 = vsub.f32 %v774_v43, %v778_v45 }
 0xb6e   :  { %v780_v47 = vmul.f32 1.442695, %v779_v46 }
 0xb70   :  { %914 = vpow2.f32 %v780_v47 }
 0xb76   :  { %v915_v13 = vpop.eup %914 }
 0xb77   :  { %v782_v48 = vsel %vm479_vm13, %v915_v13, 0.0 }
 0xb78   :  { %783 = vadd.xlane.f32.xlu1 %v782_v48 }
 0xb91   :  { %811 = vrot.lane.b32.xlu1 %v1274_v61, %s999_s25 }
 0xbeb   :  { %v784_v49 = vpop.xlane.xlu1 %783 }
 0xbec   :  { %916 = vrcp.f32 %v784_v49 }
 0xbf2   :  { %v917_v37 = vpop.eup %916 }
 0xbf3   :  { %v786_v50 = vmul.f32 %v917_v37, %v915_v13 }
 0xbf5   :  { %863 = vmatmul.msk.f32.vlgmr.msra.gmra.mxu3 %vm247_vm7, %v786_v50 }
 0xc03   :  { %v812_v53 = vpop.permute.xlu1 %811 }
 0xc04   :  { %v822_v54 = vsel %vm142_vm4, %v1250_v6, %v812_v53 }
 0xc05   :  { %v823_v55 = vsel %vm145_vm5, %v822_v54, %v816_v52 }
 0xc78   :  { %v807_v51 = vpop.f32.mrf.mxu3 }
 0xc79   :  { %819 = vrot.lane.b32.xlu2 %v807_v51, %s1004_s3 }
 0xcd3   :  { %v820_v56 = vpop.permute.xlu2 %819 }
 0xcd4   :  { %v824_v57 = vsel %vm164_vm6, %v823_v55, %v820_v56 }
 0xcd5   :  { %825 = vst [vmem:[%s1314_s9] sm:$0x1] %v824_v57 }
 0xcd6   :  { %830 = vsyncpa [#allocation3], 1 }
 0xcd7   :  { %831 = vsyncpa [#allocation5], 1 }

</bundles_post_ra>
